<compile_context>
chip_gen: v7x
topology: tpu7x:2x2x1
jax: 0.10.0
libtpu: 0.0.40
codegen_flags: <defaults>
</compile_context>

<pallas_src>
import functools

import jax
import jax.numpy as jnp
from jax.experimental import pallas as pl
from jax.experimental.pallas import tpu as pltpu

HIDDEN = 128  # hidden width from the PyTorch module


def _round_up(n, m):
    return ((n + m - 1) // m) * m


def mlp_kernel(x_ref, p_ref, o_ref, *, dim_obs_p):
    # x_ref: (batch, dim_obs_p)  p_ref: (dim_obs_p + 2*128 + 8, 128)  o_ref: (8, 128)
    r0 = dim_obs_p
    w1 = p_ref[0:r0, :]                           # (dim_obs_p, 128), zero-padded rows
    w2 = p_ref[r0:r0 + HIDDEN, :]                 # (128, 128)
    w3 = p_ref[r0 + HIDDEN:r0 + 2 * HIDDEN, :]    # (128, 128), cols >= dim_actions are 0
    b = p_ref[r0 + 2 * HIDDEN:r0 + 2 * HIDDEN + 8, :]  # (8, 128): rows 0/1/2 = b1/b2/b3

    # Row 0 of the batch (torch x[0]), replicated across 8 sublanes so every
    # matmul and the final store work on full (8, 128) tiles (no masked stores).
    x8 = jnp.broadcast_to(x_ref[0:1, :], (8, dim_obs_p))

    h1 = jnp.maximum(jnp.dot(x8, w1, preferred_element_type=jnp.float32) + b[0:1, :], 0.0)
    h2 = jnp.maximum(jnp.dot(h1, w2, preferred_element_type=jnp.float32) + b[1:2, :], 0.0)
    o_ref[...] = jnp.dot(h2, w3, preferred_element_type=jnp.float32) + b[2:3, :]


def agent_forward(x, packed, dim_actions):
    """x: (batch, dim_obs) f32; packed: pack_params(...) buffer.
    Returns (1, dim_actions) = MLP(x[0])."""
    _, dim_obs = x.shape
    dim_obs_p = _round_up(dim_obs, 8)
    if dim_obs_p != dim_obs:  # only taken when dim_obs is not sublane-aligned
        x = jnp.pad(x, ((0, 0), (0, dim_obs_p - dim_obs)))

    out_padded = pl.pallas_call(
        functools.partial(mlp_kernel, dim_obs_p=dim_obs_p),
        out_shape=jax.ShapeDtypeStruct((8, HIDDEN), jnp.float32),
        in_specs=[
            pl.BlockSpec(memory_space=pltpu.MemorySpace.VMEM),  # x  (whole array)
            pl.BlockSpec(memory_space=pltpu.MemorySpace.VMEM),  # packed params
        ],
        out_specs=pl.BlockSpec(memory_space=pltpu.MemorySpace.VMEM),
    )(x, packed)
    # TODO(synk): in a tight inference loop, keep `packed` VMEM-resident across
    # calls (cross-pallas_call prefetch / in-kernel step loop) instead of
    # re-DMAing ~86 KB of weights every invocation.
    return out_padded[0:1, :dim_actions]


def pack_params(params, dim_obs, dim_actions):
    """Pack (w1,b1,w2,b2,w3,b3) into one lane-dense (dim_obs_p+264, 128) buffer."""
    w1, b1, w2, b2, w3, b3 = params
    dim_obs_p = _round_up(dim_obs, 8)
    w1p = jnp.zeros((dim_obs_p, HIDDEN), jnp.float32).at[:dim_obs, :].set(w1)
    w3p = jnp.zeros((HIDDEN, HIDDEN), jnp.float32).at[:, :dim_actions].set(w3)
    bias = jnp.zeros((8, HIDDEN), jnp.float32)
    bias = bias.at[0, :].set(b1.reshape(-1))
    bias = bias.at[1, :].set(b2.reshape(-1))
    bias = bias.at[2, :dim_actions].set(b3.reshape(-1))
    return jnp.concatenate([w1p, w2, w3p, bias], axis=0)


def init_params(key, dim_obs, dim_actions):
    """Deterministic init mimicking PyTorch Linear default (U[-1/sqrt(fan_in), +])."""
    ks = jax.random.split(key, 6)

    def linear(kw, kb, fan_in, fan_out):
        bound = 1.0 / jnp.sqrt(jnp.float32(fan_in))
        w = jax.random.uniform(kw, (fan_in, fan_out), jnp.float32, -bound, bound)
        b = jax.random.uniform(kb, (1, fan_out), jnp.float32, -bound, bound)
        return w, b

    w1, b1 = linear(ks[0], ks[1], dim_obs, HIDDEN)
    w2, b2 = linear(ks[2], ks[3], HIDDEN, HIDDEN)
    w3, b3 = linear(ks[4], ks[5], HIDDEN, dim_actions)
    return (w1, b1, w2, b2, w3, b3)


def agent_forward_ref(x, params):
    w1, b1, w2, b2, w3, b3 = params
    x0 = x[0:1, :]
    h1 = jnp.maximum(x0 @ w1 + b1, 0.0)
    h2 = jnp.maximum(h1 @ w2 + b2, 0.0)
    return h2 @ w3 + b3


if __name__ == "__main__":
    dim_obs = 32
    dim_actions = 8
    batch = 2

    key = jax.random.PRNGKey(0)
    k_x, k_p = jax.random.split(key)
    x = jax.random.normal(k_x, (batch, dim_obs), jnp.float32)
    params = init_params(k_p, dim_obs, dim_actions)
    packed = pack_params(params, dim_obs, dim_actions)

    out = agent_forward(x, packed, dim_actions)
    out = jax.block_until_ready(out)

    ref = agent_forward_ref(x, params)
    assert out.shape == (1, dim_actions)
    assert jnp.allclose(out, ref, atol=1e-5, rtol=1e-5)

    print("KERNEL_OK")
</pallas_src>

<mosaic_0001>
module attributes {stable_mosaic.version = 11 : i64} {
  func.func @mlp_kernel(%arg0: memref<2x32xf32, #tpu.memory_space<vmem>>, %arg1: memref<296x128xf32, #tpu.memory_space<vmem>>, %arg2: memref<8x128xf32, #tpu.memory_space<vmem>>) attributes {dimension_semantics = [], scalar_prefetch = 0 : i64, scratch_operands = 0 : i64, tpu.core_type = #tpu.core_type<tc>} {
    %c0 = arith.constant 0 : index
    %c0_0 = arith.constant 0 : index
    %0 = vector.load %arg1[%c0, %c0_0] : memref<296x128xf32, #tpu.memory_space<vmem>>, vector<32x128xf32>
    %c32 = arith.constant 32 : index
    %c0_1 = arith.constant 0 : index
    %1 = vector.load %arg1[%c32, %c0_1] : memref<296x128xf32, #tpu.memory_space<vmem>>, vector<128x128xf32>
    %c160 = arith.constant 160 : index
    %c0_2 = arith.constant 0 : index
    %2 = vector.load %arg1[%c160, %c0_2] : memref<296x128xf32, #tpu.memory_space<vmem>>, vector<128x128xf32>
    %c288 = arith.constant 288 : index
    %c0_3 = arith.constant 0 : index
    %3 = vector.load %arg1[%c288, %c0_3] : memref<296x128xf32, #tpu.memory_space<vmem>>, vector<8x128xf32>
    %c0_4 = arith.constant 0 : index
    %c0_5 = arith.constant 0 : index
    %4 = vector.load %arg0[%c0_4, %c0_5] : memref<2x32xf32, #tpu.memory_space<vmem>>, vector<1x32xf32>
    %5 = vector.shape_cast %4 : vector<1x32xf32> to vector<1x32xf32>
    %6 = vector.broadcast %5 : vector<1x32xf32> to vector<8x32xf32>
    %cst = arith.constant dense<0.000000e+00> : vector<8x128xf32>
    %7 = tpu.matmul %6, %0, %cst {dimension_numbers = #tpu.dot_dimension_numbers<[1], [0], [0], [1], [0, 0, 1, 1], [], []>} : vector<8x32xf32>, vector<32x128xf32>, vector<8x128xf32> -> vector<8x128xf32>
    %8 = vector.extract_strided_slice %3 {offsets = [0, 0], sizes = [1, 128], strides = [1, 1]} : vector<8x128xf32> to vector<1x128xf32>
    %9 = vector.broadcast %8 : vector<1x128xf32> to vector<8x128xf32>
    %10 = arith.addf %7, %9 : vector<8x128xf32>
    %cst_6 = arith.constant 0.000000e+00 : f32
    %11 = vector.broadcast %cst_6 : f32 to vector<8x128xf32>
    %12 = arith.maximumf %10, %11 : vector<8x128xf32>
    %cst_7 = arith.constant dense<0.000000e+00> : vector<8x128xf32>
    %13 = tpu.matmul %12, %1, %cst_7 {dimension_numbers = #tpu.dot_dimension_numbers<[1], [0], [0], [1], [0, 0, 1, 1], [], []>} : vector<8x128xf32>, vector<128x128xf32>, vector<8x128xf32> -> vector<8x128xf32>
    %14 = vector.extract_strided_slice %3 {offsets = [1, 0], sizes = [1, 128], strides = [1, 1]} : vector<8x128xf32> to vector<1x128xf32>
    %15 = vector.broadcast %14 : vector<1x128xf32> to vector<8x128xf32>
    %16 = arith.addf %13, %15 : vector<8x128xf32>
    %cst_8 = arith.constant 0.000000e+00 : f32
    %17 = vector.broadcast %cst_8 : f32 to vector<8x128xf32>
    %18 = arith.maximumf %16, %17 : vector<8x128xf32>
    %cst_9 = arith.constant dense<0.000000e+00> : vector<8x128xf32>
    %19 = tpu.matmul %18, %2, %cst_9 {dimension_numbers = #tpu.dot_dimension_numbers<[1], [0], [0], [1], [0, 0, 1, 1], [], []>} : vector<8x128xf32>, vector<128x128xf32>, vector<8x128xf32> -> vector<8x128xf32>
    %20 = vector.extract_strided_slice %3 {offsets = [2, 0], sizes = [1, 128], strides = [1, 1]} : vector<8x128xf32> to vector<1x128xf32>
    %21 = vector.broadcast %20 : vector<1x128xf32> to vector<8x128xf32>
    %22 = arith.addf %19, %21 : vector<8x128xf32>
    %c0_10 = arith.constant 0 : index
    %c0_11 = arith.constant 0 : index
    %23 = vector.load %arg2[%c0_10, %c0_11] : memref<8x128xf32, #tpu.memory_space<vmem>>, vector<8x128xf32>
    tpu.vector_store %arg2[%c0_10, %c0_11], %22 {strides = array<i32>} : memref<8x128xf32, #tpu.memory_space<vmem>>, vector<8x128xf32>,
    return
  }
}

</mosaic_0001>

<bundles_post_ra>
// kernel: tpu_custom_call.1
= control target key start
LH: loop header
LB: loop body
LE: loop exit
PB: predicated region body
PF: predicated region fallthrough
CT: control target
= control target key end

     0   :  { %7 = vsyncpa [#allocation3], 0  ;;  %s668_s0 = inlined_call_operand.hbm [shape: f32[2,32], index: 0, kind: input, shape index: {}]   ;;  %s669_s1 = inlined_call_operand.hbm [shape: f32[296,128], index: 1, kind: input, shape index: {}]   ;;  %s670_s2 = inlined_call_operand.hbm [shape: f32[8,128], index: 2, kind: output, shape index: {}]  }
   0x1   :  { %8 = vsyncpa [#allocation6], 0 }
   0x2   :  { %9 = vsyncpa [#allocation4], 0  ;;  %s581_s9 = smov [#allocation2]   ;;  %s582_s11 = smov [#allocation5]  }
   0x3   :  { %s16_s10 = sshll.u32 %s581_s9, 4  ;;  %s25_s12 = sshll.u32 %s582_s11, 4  ;;  %s17_s10 = int_to_ptr.vmem [resolvable:$true] %s16_s10  ;;  %s604_s12 = int_to_ptr.vmem [resolvable:$true] %s25_s12 }
   0x4   :  { %s509_s15 = scalar_lea.hbm %s668_s0, 32 }
   0x5   :  { %p510_p0 = scmp.ne.s32.totalorder %s668_s0, %s509_s15  ;;  %p513_p1 = scmp.lt.u32.totalorder %s509_s15, %s668_s0 }
   0x7   :  { %p515_p2 = pnand %p513_p1, %p510_p0 }
   0x9   :  { %518 = shalt.err (!%p515_p2)
}
   0xa   :  { %s519_s20 = scalar_lea.vmem %s17_s10, 32  ;;  %p524_p4 = scmp.lt.s32.totalorder %s17_s10, %s17_s10 }
   0xb   :  { %p520_p3 = scmp.ne.s32.totalorder %s17_s10, %s519_s20  ;;  %p525_p5 = scmp.lt.s32.totalorder %s519_s20, %s519_s20 }
   0xd   :  { %p526_p6 = por %p525_p5, %p524_p4 }
   0xf   :  { %p527_p7 = pnand %p526_p6, %p520_p3 }
  0x11   :  { %530 = shalt.err (!%p527_p7)
}
  0x12   :  { %19 = dma.hbm_to_vmem [thread:$0]  %s668_s0, 32, %s17_s10, [#allocation3]  }
  0x13   :  { %s531_s25 = scalar_lea.hbm %s669_s1, 4736 }
  0x14   :  { %p532_p8 = scmp.ne.s32.totalorder %s669_s1, %s531_s25  ;;  %p535_p9 = scmp.lt.u32.totalorder %s531_s25, %s669_s1 }
  0x16   :  { %p537_p10 = pnand %p535_p9, %p532_p8 }
  0x18   :  { %540 = shalt.err (!%p537_p10)
}
  0x19   :  { %s541_s30 = scalar_lea.vmem %s604_s12, 4736  ;;  %p546_p12 = scmp.lt.s32.totalorder %s604_s12, %s604_s12 }
  0x1a   :  { %p542_p11 = scmp.ne.s32.totalorder %s604_s12, %s541_s30  ;;  %p547_p13 = scmp.lt.s32.totalorder %s541_s30, %s541_s30 }
  0x1c   :  { %p548_p0 = por %p547_p13, %p546_p12 }
  0x1e   :  { %p549_p1 = pnand %p548_p0, %p542_p11 }
  0x20   :  { %552 = shalt.err (!%p549_p1)
}
  0x21   :  { %s583_s0 = smov 128   ;;  %s584_s3 = smov 8  }
  0x22   :  { %31 = dma.hbm_to_vmem [thread:$0]  %s669_s1, 4736, %s604_s12, [#allocation6], %s583_s0, %s583_s0, %s584_s3  }
  0x23   :  { %575 = dma.done.wait [#allocation3], 32  }
  0x24   :  { %576 = vsyncadd [#allocation3], 4294967264 }
  0x25   :  { %577 = dma.done.wait [#allocation6], 4736  }
  0x26   :  { %578 = vsyncadd [#allocation6], 4294962560  ;;  %v585_v0 = vmov 0.0|0.0   ;;  %vm586_vm0 = vmmov 0   ;;  %v587_v1 = vmov 0.0   ;;  %v38_v2 = vld [vmem:[#allocation5] sm:$0xff]  ;;  %v80_v54 = vlaneseq }
  0x27   :  { %447 = vmatprep.subr.bf16.mxu0 %v585_v0  ;;  %374 = vmatprep.mubr.msk.f32.mxu0 %vm586_vm0, %v587_v1  ;;  %v39_v3 = vld [vmem:[#allocation5 + $0x8] sm:$0xff]  ;;  %v40_v4 = vld [vmem:[#allocation5 + $0x10] sm:$0xff]  ;;  %v41_v6 = vld [vmem:[#allocation5 + $0x18] sm:$0xff]  ;;  %vm84_vm1 = vcmask 261120   ;;  %s588_s1 = smov [#allocation7]  }
  0x28   :  { %453 = vmatprep.subr.bf16.mxu1 %v585_v0  ;;  %409 = vmatprep.mubr.msk.f32.mxu1 %vm586_vm0, %v587_v1  ;;  %v448_v5 = vpack.c.bf16 %v39_v3, %v38_v2  ;;  %v42_v7 = vld [vmem:[#allocation5 + $0x20] sm:$0xff]  ;;  %v43_v8 = vld [vmem:[#allocation5 + $0x28] sm:$0xff]  ;;  %v44_v9 = vld [vmem:[#allocation5 + $0x30] sm:$0xff]  ;;  %v451_v11 = vpack.c.bf16 %v41_v6, %v40_v4  ;;  %v81_v55 = vshrl.u32 %v80_v54, 7  ;;  %s315_s6 = sshll.u32 %s588_s1, 4  ;;  %s316_s6 = int_to_ptr.vmem [resolvable:$true] %s315_s6 }
  0x29   :  { %v45_v10 = vld [vmem:[#allocation5 + $0x38] sm:$0xff]  ;;  %v454_v12 = vpack.c.bf16 %v43_v8, %v42_v7  ;;  %v46_v14 = vld [vmem:[#allocation5 + $0x40] sm:$0xff]  ;;  %v47_v15 = vld [vmem:[#allocation5 + $0x48] sm:$0xff]  ;;  %s553_s7 = scalar_lea.vmem %s316_s6, 128  ;;  %p558_p3 = scmp.lt.s32.totalorder %s316_s6, %s316_s6 }
  0x2a   :  { %449 = vmatpush3.bf16.msra.mxu0 %v448_v5  ;;  %v457_v13 = vpack.c.bf16 %v45_v10, %v44_v9  ;;  %v325_v16 = vld [vmem:[#allocation2] ss:$0 sm:$0xff]  ;;  %v460_v17 = vpack.c.bf16 %v47_v15, %v46_v14  ;;  %v48_v18 = vld [vmem:[#allocation5 + $0x50] sm:$0xff]  ;;  %v50_v21 = vld [vmem:[#allocation5 + $0x60] sm:$0xff]  ;;  %v82_v56 = vsub.s32 0, %v81_v55  ;;  %v161_v3 = vsub.s32 1, %v81_v55  ;;  %p554_p2 = scmp.ne.s32.totalorder %s316_s6, %s553_s7  ;;  %p559_p4 = scmp.lt.s32.totalorder %s553_s7, %s553_s7 }
  0x2b   :  { %450 = vmatprep.subr.bf16.mxu0 %v585_v0  ;;  %455 = vmatpush3.bf16.msra.mxu1 %v454_v12  ;;  %v49_v19 = vld [vmem:[#allocation5 + $0x58] sm:$0xff]  ;;  %v51_v22 = vld [vmem:[#allocation5 + $0x68] sm:$0xff]  ;;  %v52_v24 = vld [vmem:[#allocation5 + $0x70] sm:$0xff]  ;;  %v236_v8 = vsub.s32 2, %v81_v55 }
  0x2c   :  { %456 = vmatprep.subr.bf16.mxu1 %v585_v0  ;;  %v463_v20 = vpack.c.bf16 %v49_v19, %v48_v18  ;;  %v466_v23 = vpack.c.bf16 %v51_v22, %v50_v21  ;;  %v53_v25 = vld [vmem:[#allocation5 + $0x78] sm:$0xff]  ;;  %v54_v27 = vld [vmem:[#allocation5 + $0x80] sm:$0xff]  ;;  %v55_v28 = vld [vmem:[#allocation5 + $0x88] sm:$0xff]  ;;  %p560_p5 = por %p559_p4, %p558_p3 }
  0x2d   :  { %v469_v26 = vpack.c.bf16 %v53_v25, %v52_v24  ;;  %v472_v29 = vpack.c.bf16 %v55_v28, %v54_v27  ;;  %v56_v30 = vld [vmem:[#allocation5 + $0x90] sm:$0xff]  ;;  %v57_v31 = vld [vmem:[#allocation5 + $0x98] sm:$0xff]  ;;  %v58_v33 = vld [vmem:[#allocation5 + $0xa0] sm:$0xff] }
  0x2e   :  { %452 = vmatpush3.bf16.msra.mxu0 %v451_v11  ;;  %v475_v32 = vpack.c.bf16 %v57_v31, %v56_v30  ;;  %v59_v34 = vld [vmem:[#allocation5 + $0xa8] sm:$0xff]  ;;  %v60_v35 = vld [vmem:[#allocation5 + $0xb0] sm:$0xff]  ;;  %v61_v37 = vld [vmem:[#allocation5 + $0xb8] sm:$0xff]  ;;  %p561_p6 = pnand %p560_p5, %p554_p2 }
  0x2f   :  { %477 = vmatprep.subr.bf16.mxu0 %v585_v0  ;;  %458 = vmatpush3.bf16.msra.mxu1 %v457_v13  ;;  %v478_v36 = vpack.c.bf16 %v59_v34, %v58_v33  ;;  %v481_v38 = vpack.c.bf16 %v61_v37, %v60_v35  ;;  %v62_v39 = vld [vmem:[#allocation5 + $0xc0] sm:$0xff]  ;;  %v63_v40 = vld [vmem:[#allocation5 + $0xc8] sm:$0xff]  ;;  %v64_v42 = vld [vmem:[#allocation5 + $0xd0] sm:$0xff] }
  0x30   :  { %459 = vmatprep.subr.bf16.mxu1 %v585_v0  ;;  %v484_v41 = vpack.c.bf16 %v63_v40, %v62_v39  ;;  %v65_v43 = vld [vmem:[#allocation5 + $0xd8] sm:$0xff]  ;;  %v66_v45 = vld [vmem:[#allocation5 + $0xe0] sm:$0xff]  ;;  %v67_v46 = vld [vmem:[#allocation5 + $0xe8] sm:$0xff] }
  0x31   :  { %375 = vmatmul.mubr.msk.f32.vlgmr.msra.gmra.mrb[0].mxu0 %vm84_vm1, %v325_v16  ;;  %v487_v44 = vpack.c.bf16 %v65_v43, %v64_v42  ;;  %v490_v47 = vpack.c.bf16 %v67_v46, %v66_v45  ;;  %v68_v48 = vld [vmem:[#allocation5 + $0xf0] sm:$0xff]  ;;  %v69_v49 = vld [vmem:[#allocation5 + $0xf8] sm:$0xff]  ;;  %v70_v51 = vld [vmem:[#allocation5 + $0x100] sm:$0xff] }
  0x32   :  { %444 = vmatprep.mubr.msk.f32.mxu0 %vm586_vm0, %v587_v1  ;;  %479 = vmatpush3.bf16.msra.mxu0 %v478_v36  ;;  %v493_v50 = vpack.c.bf16 %v69_v49, %v68_v48  ;;  %v71_v52 = vld [vmem:[#allocation5 + $0x108] sm:$0xff]  ;;  %v74_v57 = vld [vmem:[#allocation5 + $0x120] sm:$0xff]  ;;  %v72_v63 = vld [vmem:[#allocation5 + $0x110] sm:$0xff] }
  0x33   :  { %461 = vmatpush3.bf16.msra.mxu1 %v460_v17  ;;  %480 = vmatprep.subr.bf16.mxu0 %v585_v0  ;;  %v496_v53 = vpack.c.bf16 %v71_v52, %v70_v51  ;;  %v83_v58 = vrot.slane %v74_v57, %v82_v56  ;;  %v73_v1 = vld [vmem:[#allocation5 + $0x118] sm:$0xff]  ;;  %v162_v4 = vrot.slane %v74_v57, %v161_v3 }
  0x34   :  { %462 = vmatprep.subr.bf16.mxu1 %v585_v0  ;;  %v499_v2 = vpack.c.bf16 %v73_v1, %v72_v63  ;;  %v237_v9 = vrot.slane %v74_v57, %v236_v8 }
  0x36   :  { %482 = vmatpush3.bf16.msra.mxu0 %v481_v38 }
  0x37   :  { %464 = vmatpush3.bf16.msra.mxu1 %v463_v20  ;;  %483 = vmatprep.subr.bf16.mxu0 %v585_v0 }
  0x38   :  { %465 = vmatprep.subr.bf16.mxu1 %v585_v0 }
  0x3a   :  { %485 = vmatpush3.bf16.msra.mxu0 %v484_v41 }
  0x3b   :  { %467 = vmatpush3.bf16.msra.mxu1 %v466_v23  ;;  %486 = vmatprep.subr.bf16.mxu0 %v585_v0 }
  0x3c   :  { %468 = vmatprep.subr.bf16.mxu1 %v585_v0 }
  0x3e   :  { %488 = vmatpush3.bf16.msra.mxu0 %v487_v44 }
  0x3f   :  { %470 = vmatpush3.bf16.msra.mxu1 %v469_v26  ;;  %489 = vmatprep.subr.bf16.mxu0 %v585_v0 }
  0x40   :  { %471 = vmatprep.subr.bf16.mxu1 %v585_v0 }
  0x42   :  { %491 = vmatpush3.bf16.msra.mxu0 %v490_v47 }
  0x43   :  { %473 = vmatpush3.bf16.msra.mxu1 %v472_v29  ;;  %492 = vmatprep.subr.bf16.mxu0 %v585_v0 }
  0x44   :  { %474 = vmatprep.subr.bf16.mxu1 %v585_v0 }
  0x46   :  { %494 = vmatpush3.bf16.msra.mxu0 %v493_v50 }
  0x47   :  { %476 = vmatpush3.bf16.msra.mxu1 %v475_v32  ;;  %495 = vmatprep.subr.bf16.mxu0 %v585_v0 }
  0x4a   :  { %497 = vmatpush3.bf16.msra.mxu0 %v496_v53 }
  0x4b   :  { %498 = vmatprep.subr.bf16.mxu0 %v585_v0 }
  0x4e   :  { %500 = vmatpush3.bf16.msra.mxu0 %v499_v2 }
 0x104   :  { %v154_v59 = vpop.f32.mrb[0].mxu0 }
 0x105   :  { %v155_v60 = vadd.f32 %v154_v59, %v83_v58  ;;  %v376_v61 = vpop.f32.mrb[1].mxu0 }
 0x107   :  { %v158_v62 = vmax.f32 %v155_v60, 0.0 }
 0x109   :  { %410 = vmatmul.mubr.f32.vlgmr.msra.gmra.mrb[0].mxu1 %v158_v62 }
 0x1dc   :  { %v229_v5 = vpop.f32.mrb[0].mxu1 }
 0x1dd   :  { %v230_v6 = vadd.f32 %v229_v5, %v162_v4  ;;  %v411_v7 = vpop.f32.mrb[1].mxu1 }
 0x1df   :  { %v233_v0 = vmax.f32 %v230_v6, 0.0 }
 0x1e1   :  { %445 = vmatmul.mubr.f32.vlgmr.msra.gmra.mrb[2].mxu0 %v233_v0 }
 0x2b4   :  { %v304_v10 = vpop.f32.mrb[2].mxu0 }
 0x2b5   :  { %v305_v11 = vadd.f32 %v304_v10, %v237_v9  ;;  %v446_v12 = vpop.f32.mrb[3].mxu0 }
 0x2b7   :  { %308 = vst [vmem:[#allocation7] sm:$0xff] %v305_v11 }
 0x2b8   :  { %564 = shalt.err (!%p561_p6)
}
 0x2b9   :  { %s565_s10 = scalar_lea.hbm %s670_s2, 128 }
 0x2ba   :  { %p566_p7 = scmp.ne.s32.totalorder %s670_s2, %s565_s10  ;;  %p569_p8 = scmp.lt.u32.totalorder %s565_s10, %s670_s2 }
 0x2bc   :  { %p571_p9 = pnand %p569_p8, %p566_p7 }
 0x2be   :  { %574 = shalt.err (!%p571_p9)
}
 0x2bf   :  { %318 = dma.vmem_to_hbm [thread:$0]  %s316_s6, 128, %s670_s2, [#allocation4]  }
 0x2c0   :  { %579 = dma.done.wait [#allocation4], 128  }
 0x2c1   :  { %580 = vsyncadd [#allocation4], 4294967168 }
 0x2c2   :  { %322 = vsyncpa [#allocation3], 1 }
 0x2c3   :  { %323 = vsyncpa [#allocation6], 1 }
 0x2c4   :  { %324 = vsyncpa [#allocation4], 1 }

</bundles_post_ra>
